<compile_context>
chip_gen: v7x
topology: tpu7x:2x2x1
jax: 0.10.0
libtpu: 0.0.40
codegen_flags: <defaults>
</compile_context>

<pallas_src>
import jax
import jax.numpy as jnp
from jax.experimental import pallas as pl
from jax.experimental.pallas import tpu as pltpu


def _round_up(n: int, m: int) -> int:
    return (n + m - 1) // m * m


def _mlp_kernel(x_ref, w1_ref, b1_ref, w2_ref, b2_ref, o_ref):
    # fc1: (TB, Ip)bf16 @ (Ip, Hp)bf16 -> f32 accumulator on the MXU.
    x = x_ref[...].astype(jnp.bfloat16)
    h = jnp.dot(x, w1_ref[...], preferred_element_type=jnp.float32)
    # Bias add + ReLU in f32 (VPU).
    h = jnp.maximum(h + b1_ref[...], 0.0)
    # fc2: explicit, intentional bf16 cast of the f32 intermediate for the MXU.
    o = jnp.dot(h.astype(jnp.bfloat16), w2_ref[...],
                preferred_element_type=jnp.float32)
    # Bias add in f32, then single lane-dense store.
    o_ref[...] = (o + b2_ref[...]).astype(o_ref.dtype)


def mlp_projection(x, w1, b1, w2, b2, batch_size, *, block_b=256):
    """Forward pass of MLPProjection.

    x:  (B, ...)                     -> flattened to (B, input_size)
    w1: (input_size, hidden_size)    (pre-transposed fc1 weight)
    b1: (hidden_size,)
    w2: (hidden_size, output_size)   (pre-transposed fc2 weight)
    b2: (output_size,)
    returns: (B, batch_size, output_size // batch_size)
    """
    B = x.shape[0]
    x2d = x.reshape(B, -1)                     # x.view(x.size(0), -1)
    I, H = w1.shape
    H2, O = w2.shape
    assert x2d.shape[1] == I and H2 == H
    out_dtype = x2d.dtype

    # Lane-pad feature dims to 128; pick a batch tile that is a multiple of 8
    # (256 rows per tile for real batches, the whole padded batch when small).
    Ip = _round_up(I, 128)
    Hp = _round_up(H, 128)
    Op = _round_up(O, 128)
    TB = min(block_b, _round_up(B, 8))
    Bp = _round_up(B, TB)

    # Zero-pad and cast once in the wrapper (XLA fuses pad + convert).
    xp = jnp.pad(x2d, ((0, Bp - B), (0, Ip - I))).astype(jnp.bfloat16)
    w1p = jnp.pad(w1, ((0, Ip - I), (0, Hp - H))).astype(jnp.bfloat16)
    w2p = jnp.pad(w2, ((0, Hp - H), (0, Op - O))).astype(jnp.bfloat16)
    b1p = jnp.pad(b1, (0, Hp - H)).astype(jnp.float32).reshape(1, Hp)
    b2p = jnp.pad(b2, (0, Op - O)).astype(jnp.float32).reshape(1, Op)

    grid = (Bp // TB,)
    out = pl.pallas_call(
        _mlp_kernel,
        out_shape=jax.ShapeDtypeStruct((Bp, Op), out_dtype),
        grid_spec=pl.GridSpec(
            grid=grid,
            in_specs=[
                pl.BlockSpec((TB, Ip), lambda i: (i, 0)),   # x tile (pipelined)
                pl.BlockSpec((Ip, Hp), lambda i: (0, 0)),   # w1 resident
                pl.BlockSpec((1, Hp), lambda i: (0, 0)),    # b1 resident
                pl.BlockSpec((Hp, Op), lambda i: (0, 0)),   # w2 resident
                pl.BlockSpec((1, Op), lambda i: (0, 0)),    # b2 resident
            ],
            out_specs=pl.BlockSpec((TB, Op), lambda i: (i, 0)),
        ),
        compiler_params=pltpu.CompilerParams(
            dimension_semantics=("parallel",),          # megacore-shard batch
            vmem_limit_bytes=64 * 1024 * 1024,
        ),
    )(xp, w1p, b1p, w2p, b2p)

    out = out[:B, :O]
    # x.view(x.size(0), self.bs, -1)
    return out.reshape(B, batch_size, -1)


def _init_linear(key, in_features, out_features, dtype=jnp.float32):
    """Deterministic init mimicking PyTorch's nn.Linear default
    (uniform in [-1/sqrt(in), 1/sqrt(in)]).

    Returns weight already transposed to (in_features, out_features)."""
    kw, kb = jax.random.split(key)
    bound = 1.0 / jnp.sqrt(jnp.asarray(in_features, dtype))
    w = jax.random.uniform(kw, (in_features, out_features), dtype,
                           minval=-bound, maxval=bound)
    b = jax.random.uniform(kb, (out_features,), dtype,
                           minval=-bound, maxval=bound)
    return w, b


if __name__ == "__main__":
    # Small shapes consistent with the module:
    #   x: (B, 4, 8)  -> flattened input_size = 32
    #   hidden_size = 64, output_size = 64, module batch_size (self.bs) = 4
    #   output: (B, 4, 16)
    B = 2
    input_size = 4 * 8
    hidden_size = 64
    output_size = 64
    bs = 4

    key = jax.random.PRNGKey(0)
    kx, k1, k2 = jax.random.split(key, 3)

    x = jax.random.normal(kx, (B, 4, 8), jnp.float32)
    w1, b1 = _init_linear(k1, input_size, hidden_size)
    w2, b2 = _init_linear(k2, hidden_size, output_size)

    out = mlp_projection(x, w1, b1, w2, b2, bs)
    out = jax.block_until_ready(out)

    # Reference in plain JAX, matching the kernel's bf16-matmul / f32-accumulate
    # numerics (bias add and ReLU in f32).
    x2d = x.reshape(B, -1)
    h_ref = jnp.dot(x2d.astype(jnp.bfloat16), w1.astype(jnp.bfloat16),
                    preferred_element_type=jnp.float32) + b1
    h_ref = jnp.maximum(h_ref, 0.0)
    ref = jnp.dot(h_ref.astype(jnp.bfloat16), w2.astype(jnp.bfloat16),
                  preferred_element_type=jnp.float32) + b2
    ref = ref.reshape(B, bs, -1)

    assert out.shape == (B, bs, output_size // bs), out.shape
    assert jnp.allclose(out, ref, atol=1e-3, rtol=1e-3)

    print("KERNEL_OK")
</pallas_src>

<mosaic_0001>
module attributes {stable_mosaic.version = 11 : i64} {
  func.func @_mlp_kernel(%arg0: i32, %arg1: memref<8x128xbf16, #tpu.memory_space<vmem>>, %arg2: memref<128x128xbf16, #tpu.memory_space<vmem>>, %arg3: memref<1x128xf32, #tpu.memory_space<vmem>>, %arg4: memref<128x128xbf16, #tpu.memory_space<vmem>>, %arg5: memref<1x128xf32, #tpu.memory_space<vmem>>, %arg6: memref<8x128xf32, #tpu.memory_space<vmem>>) attributes {dimension_semantics = [#tpu.dimension_semantics<parallel>], iteration_bounds = array<i64: 1>, scalar_prefetch = 0 : i64, scratch_operands = 0 : i64, tpu.core_type = #tpu.core_type<tc>, window_params = [{transform_indices = @transform_0, window_bounds = array<i64: 8, 128>}, {pipeline_mode = #tpu.pipeline_mode<synchronous>, transform_indices = @transform_1, window_bounds = array<i64: 128, 128>}, {pipeline_mode = #tpu.pipeline_mode<synchronous>, transform_indices = @transform_2, window_bounds = array<i64: 1, 128>}, {pipeline_mode = #tpu.pipeline_mode<synchronous>, transform_indices = @transform_3, window_bounds = array<i64: 128, 128>}, {pipeline_mode = #tpu.pipeline_mode<synchronous>, transform_indices = @transform_4, window_bounds = array<i64: 1, 128>}, {transform_indices = @transform_5, window_bounds = array<i64: 8, 128>}]} {
    %c0 = arith.constant 0 : index
    %c0_0 = arith.constant 0 : index
    %0 = vector.load %arg1[%c0, %c0_0] : memref<8x128xbf16, #tpu.memory_space<vmem>>, vector<8x128xbf16>
    %c0_1 = arith.constant 0 : index
    %c0_2 = arith.constant 0 : index
    %1 = vector.load %arg2[%c0_1, %c0_2] : memref<128x128xbf16, #tpu.memory_space<vmem>>, vector<128x128xbf16>
    %cst = arith.constant dense<0.000000e+00> : vector<8x128xf32>
    %2 = tpu.matmul %0, %1, %cst {dimension_numbers = #tpu.dot_dimension_numbers<[1], [0], [0], [1], [0, 0, 1, 1], [], []>} : vector<8x128xbf16>, vector<128x128xbf16>, vector<8x128xf32> -> vector<8x128xf32>
    %c0_3 = arith.constant 0 : index
    %c0_4 = arith.constant 0 : index
    %3 = vector.load %arg3[%c0_3, %c0_4] : memref<1x128xf32, #tpu.memory_space<vmem>>, vector<1x128xf32>
    %4 = vector.broadcast %3 : vector<1x128xf32> to vector<8x128xf32>
    %5 = arith.addf %2, %4 : vector<8x128xf32>
    %cst_5 = arith.constant 0.000000e+00 : f32
    %6 = vector.broadcast %cst_5 : f32 to vector<8x128xf32>
    %7 = arith.maximumf %5, %6 : vector<8x128xf32>
    %8 = arith.truncf %7 : vector<8x128xf32> to vector<8x128xbf16>
    %c0_6 = arith.constant 0 : index
    %c0_7 = arith.constant 0 : index
    %9 = vector.load %arg4[%c0_6, %c0_7] : memref<128x128xbf16, #tpu.memory_space<vmem>>, vector<128x128xbf16>
    %cst_8 = arith.constant dense<0.000000e+00> : vector<8x128xf32>
    %10 = tpu.matmul %8, %9, %cst_8 {dimension_numbers = #tpu.dot_dimension_numbers<[1], [0], [0], [1], [0, 0, 1, 1], [], []>} : vector<8x128xbf16>, vector<128x128xbf16>, vector<8x128xf32> -> vector<8x128xf32>
    %c0_9 = arith.constant 0 : index
    %c0_10 = arith.constant 0 : index
    %11 = vector.load %arg5[%c0_9, %c0_10] : memref<1x128xf32, #tpu.memory_space<vmem>>, vector<1x128xf32>
    %12 = vector.broadcast %11 : vector<1x128xf32> to vector<8x128xf32>
    %13 = arith.addf %10, %12 : vector<8x128xf32>
    %c0_11 = arith.constant 0 : index
    %c0_12 = arith.constant 0 : index
    %14 = vector.load %arg6[%c0_11, %c0_12] : memref<8x128xf32, #tpu.memory_space<vmem>>, vector<8x128xf32>
    tpu.vector_store %arg6[%c0_11, %c0_12], %13 {strides = array<i32>} : memref<8x128xf32, #tpu.memory_space<vmem>>, vector<8x128xf32>,
    return
  }
  func.func @transform_0(%arg0: i32) -> (i32, i32) {
    %c0_i32 = arith.constant 0 : i32
    %c0_i32_0 = arith.constant 0 : i32
    return %arg0, %c0_i32 : i32, i32
  }
  func.func @transform_1(%arg0: i32) -> (i32, i32) {
    %c0_i32 = arith.constant 0 : i32
    %c0_i32_0 = arith.constant 0 : i32
    %c0_i32_1 = arith.constant 0 : i32
    return %c0_i32, %c0_i32_0 : i32, i32
  }
  func.func @transform_2(%arg0: i32) -> (i32, i32) {
    %c0_i32 = arith.constant 0 : i32
    %c0_i32_0 = arith.constant 0 : i32
    %c0_i32_1 = arith.constant 0 : i32
    return %c0_i32, %c0_i32_0 : i32, i32
  }
  func.func @transform_3(%arg0: i32) -> (i32, i32) {
    %c0_i32 = arith.constant 0 : i32
    %c0_i32_0 = arith.constant 0 : i32
    %c0_i32_1 = arith.constant 0 : i32
    return %c0_i32, %c0_i32_0 : i32, i32
  }
  func.func @transform_4(%arg0: i32) -> (i32, i32) {
    %c0_i32 = arith.constant 0 : i32
    %c0_i32_0 = arith.constant 0 : i32
    %c0_i32_1 = arith.constant 0 : i32
    return %c0_i32, %c0_i32_0 : i32, i32
  }
  func.func @transform_5(%arg0: i32) -> (i32, i32) {
    %c0_i32 = arith.constant 0 : i32
    %c0_i32_0 = arith.constant 0 : i32
    return %arg0, %c0_i32 : i32, i32
  }
}

</mosaic_0001>

<bundles_post_ra>
// kernel: tpu_custom_call.1
= control target key start
LH: loop header
LB: loop body
LE: loop exit
PB: predicated region body
PF: predicated region fallthrough
CT: control target
= control target key end

     0   :  { %10 = vsyncpa [#allocation3], 0  ;;  %s681_s0 = inlined_call_operand.hbm [shape: bf16[8,128], index: 0, kind: input, shape index: {}]   ;;  %s682_s1 = inlined_call_operand.hbm [shape: bf16[128,128], index: 1, kind: input, shape index: {}]   ;;  %s683_s2 = inlined_call_operand.hbm [shape: f32[1,128], index: 2, kind: input, shape index: {}]   ;;  %s684_s3 = inlined_call_operand.hbm [shape: bf16[128,128], index: 3, kind: input, shape index: {}]   ;;  %s685_s4 = inlined_call_operand.hbm [shape: f32[1,128], index: 4, kind: input, shape index: {}]   ;;  %s686_s5 = inlined_call_operand.hbm [shape: f32[8,128], index: 5, kind: output, shape index: {}]  }
   0x1   :  { %11 = vsyncpa [#allocation6], 0 }
   0x2   :  { %12 = vsyncpa [#allocation9], 0 }
   0x3   :  { %13 = vsyncpa [#allocation4], 0  ;;  %s569_s18 = smov [#allocation5]   ;;  %s429_s22 = scalar_lea.hbm %s682_s1, 1024 }
   0x4   :  { %s29_s19 = sshll.u32 %s569_s18, 4  ;;  %p430_p0 = scmp.ne.s32.totalorder %s682_s1, %s429_s22  ;;  %s30_s19 = int_to_ptr.vmem [resolvable:$true] %s29_s19 }
   0x5   :  { %p433_p1 = scmp.lt.u32.totalorder %s429_s22, %s682_s1 }
   0x7   :  { %p435_p2 = pnand %p433_p1, %p430_p0 }
   0x9   :  { %438 = shalt.err (!%p435_p2)
}
   0xa   :  { %s439_s27 = scalar_lea.vmem %s30_s19, 1024  ;;  %p444_p4 = scmp.lt.s32.totalorder %s30_s19, %s30_s19 }
   0xb   :  { %p440_p3 = scmp.ne.s32.totalorder %s30_s19, %s439_s27  ;;  %p445_p5 = scmp.lt.s32.totalorder %s439_s27, %s439_s27 }
   0xd   :  { %p446_p6 = por %p445_p5, %p444_p4 }
   0xf   :  { %p447_p7 = pnand %p446_p6, %p440_p3 }
  0x11   :  { %450 = shalt.err (!%p447_p7)
}
  0x12   :  { %s570_s28 = smov 64   ;;  %s571_s29 = smov 4  }
  0x13   :  { %35 = dma.hbm_to_vmem [thread:$0]  %s682_s1, 1024, %s30_s19, [#allocation6], %s570_s28, %s570_s28, %s571_s29  }
  0x14   :  { %s572_s7 = smov [#allocation8]   ;;  %s573_s9 = smov [#allocation2]  }
  0x15   :  { %s51_s8 = sshll.u32 %s572_s7, 4  ;;  %s20_s10 = sshll.u32 %s573_s9, 4  ;;  %s52_s8 = int_to_ptr.vmem [resolvable:$true] %s51_s8  ;;  %s21_s10 = int_to_ptr.vmem [resolvable:$true] %s20_s10 }
  0x16   :  { %s451_s13 = scalar_lea.hbm %s684_s3, 1024 }
  0x17   :  { %p452_p8 = scmp.ne.s32.totalorder %s684_s3, %s451_s13  ;;  %p455_p9 = scmp.lt.u32.totalorder %s451_s13, %s684_s3 }
  0x19   :  { %p457_p10 = pnand %p455_p9, %p452_p8 }
  0x1b   :  { %460 = shalt.err (!%p457_p10)
}
  0x1c   :  { %s461_s1 = scalar_lea.vmem %s52_s8, 1024  ;;  %p466_p12 = scmp.lt.s32.totalorder %s52_s8, %s52_s8 }
  0x1d   :  { %p462_p11 = scmp.ne.s32.totalorder %s52_s8, %s461_s1  ;;  %p467_p13 = scmp.lt.s32.totalorder %s461_s1, %s461_s1 }
  0x1f   :  { %p468_p0 = por %p467_p13, %p466_p12 }
  0x21   :  { %p469_p1 = pnand %p468_p0, %p462_p11 }
  0x23   :  { %472 = shalt.err (!%p469_p1)
}
  0x24   :  { %57 = dma.hbm_to_vmem [thread:$0]  %s684_s3, 1024, %s52_s8, [#allocation9], %s570_s28, %s570_s28, %s571_s29  }
  0x25   :  { %s473_s22 = scalar_lea.hbm %s681_s0, 64 }
  0x26   :  { %p474_p2 = scmp.ne.s32.totalorder %s681_s0, %s473_s22  ;;  %p477_p3 = scmp.lt.u32.totalorder %s473_s22, %s681_s0 }
  0x28   :  { %p479_p4 = pnand %p477_p3, %p474_p2 }
  0x2a   :  { %482 = shalt.err (!%p479_p4)
}
  0x2b   :  { %s483_s27 = scalar_lea.vmem %s21_s10, 64  ;;  %p488_p6 = scmp.lt.s32.totalorder %s21_s10, %s21_s10 }
  0x2c   :  { %p484_p5 = scmp.ne.s32.totalorder %s21_s10, %s483_s27  ;;  %p489_p7 = scmp.lt.s32.totalorder %s483_s27, %s483_s27 }
  0x2e   :  { %p490_p8 = por %p489_p7, %p488_p6 }
  0x30   :  { %p491_p9 = pnand %p490_p8, %p484_p5 }
  0x32   :  { %494 = shalt.err (!%p491_p9)
}
  0x33   :  { %23 = dma.hbm_to_vmem [thread:$0]  %s681_s0, 64, %s21_s10, [#allocation3]  }
  0x34   :  { %s574_s29 = smov [#allocation7]   ;;  %s575_s6 = smov [#allocation10]  }
  0x35   :  { %s42_s30 = sshll.u32 %s574_s29, 4  ;;  %s64_s7 = sshll.u32 %s575_s6, 4  ;;  %s43_s30 = int_to_ptr.vmem [resolvable:$true] %s42_s30  ;;  %s65_s7 = int_to_ptr.vmem [resolvable:$true] %s64_s7 }
  0x36   :  { %s495_s11 = scalar_lea.hbm %s683_s2, 16 }
  0x37   :  { %p496_p10 = scmp.ne.s32.totalorder %s683_s2, %s495_s11  ;;  %p499_p11 = scmp.lt.u32.totalorder %s495_s11, %s683_s2 }
  0x39   :  { %p501_p12 = pnand %p499_p11, %p496_p10 }
  0x3b   :  { %504 = shalt.err (!%p501_p12)
}
  0x3c   :  { %s505_s0 = scalar_lea.vmem %s43_s30, 16  ;;  %s509_s10 = scalar_lea.vmem %s43_s30, 32 }
  0x3d   :  { %p506_p13 = scmp.ne.s32.totalorder %s43_s30, %s505_s0  ;;  %p510_p0 = scmp.lt.s32.totalorder %s43_s30, %s43_s30 }
  0x3e   :  { %p511_p1 = scmp.lt.s32.totalorder %s509_s10, %s505_s0 }
  0x40   :  { %p512_p2 = por %p511_p1, %p510_p0 }
  0x42   :  { %p513_p3 = pnand %p512_p2, %p506_p13 }
  0x44   :  { %516 = shalt.err (!%p513_p3)
}
  0x45   :  { %45 = dma.hbm_to_vmem [thread:$0]  %s683_s2, 16, %s43_s30, [#allocation6]  }
  0x46   :  { %s517_s19 = scalar_lea.hbm %s685_s4, 16 }
  0x47   :  { %p518_p4 = scmp.ne.s32.totalorder %s685_s4, %s517_s19  ;;  %p521_p5 = scmp.lt.u32.totalorder %s517_s19, %s685_s4 }
  0x49   :  { %p523_p6 = pnand %p521_p5, %p518_p4 }
  0x4b   :  { %526 = shalt.err (!%p523_p6)
}
  0x4c   :  { %s527_s24 = scalar_lea.vmem %s65_s7, 16  ;;  %s531_s25 = scalar_lea.vmem %s65_s7, 32 }
  0x4d   :  { %p528_p7 = scmp.ne.s32.totalorder %s65_s7, %s527_s24  ;;  %p532_p8 = scmp.lt.s32.totalorder %s65_s7, %s65_s7 }
  0x4e   :  { %p533_p9 = scmp.lt.s32.totalorder %s531_s25, %s527_s24 }
  0x50   :  { %p534_p10 = por %p533_p9, %p532_p8 }
  0x52   :  { %p535_p11 = pnand %p534_p10, %p528_p7 }
  0x54   :  { %538 = shalt.err (!%p535_p11)
}
  0x55   :  { %67 = dma.hbm_to_vmem [thread:$0]  %s685_s4, 16, %s65_s7, [#allocation9]  }
  0x56   :  { %561 = dma.done.wait [#allocation3], 64  }
  0x57   :  { %562 = vsyncadd [#allocation3], 4294967232 }
  0x58   :  { %563 = dma.done.wait [#allocation6], 1040  }
  0x59   :  { %564 = vsyncadd [#allocation6], 4294966256 }
  0x5a   :  { %565 = dma.done.wait [#allocation9], 1040  }
  0x5b   :  { %566 = vsyncadd [#allocation9], 4294966256  ;;  %v576_v0 = vmov 0.0   ;;  %vm577_vm0 = vmmov 0   ;;  %v413_v1 = vld [vmem:[#allocation5] sm:$0xff]   ;;  %v414_v2 = vld [vmem:[#allocation5 + $0x8] sm:$0xff]  }
  0x5c   :  { %363 = vmatprep.subr.bf16.mxu0 %v576_v0  ;;  %379 = vmatprep.mubr.msk.bf16.mxu0 %vm577_vm0, %v576_v0  ;;  %v415_v3 = vld [vmem:[#allocation5 + $0x10] sm:$0xff]   ;;  %v421_v4 = vld [vmem:[#allocation8] sm:$0xff]   ;;  %v416_v5 = vld [vmem:[#allocation5 + $0x18] sm:$0xff]   ;;  %s578_s4 = smov [#allocation11]  }
  0x5d   :  { %383 = vmatprep.subr.bf16.mxu1 %v576_v0  ;;  %399 = vmatprep.mubr.msk.bf16.mxu1 %vm577_vm0, %v576_v0  ;;  %v422_v6 = vld [vmem:[#allocation8 + $0x8] sm:$0xff]   ;;  %v417_v7 = vld [vmem:[#allocation5 + $0x20] sm:$0xff]   ;;  %v423_v8 = vld [vmem:[#allocation8 + $0x10] sm:$0xff]   ;;  %s316_s27 = sshll.u32 %s578_s4, 4  ;;  %s317_s27 = int_to_ptr.vmem [resolvable:$true] %s316_s27 }
  0x5e   :  { %364 = vmatpush3.bf16.msra.mxu0 %v413_v1  ;;  %384 = vmatpush3.bf16.msra.mxu1 %v421_v4  ;;  %v418_v9 = vld [vmem:[#allocation5 + $0x28] sm:$0xff]   ;;  %v424_v10 = vld [vmem:[#allocation8 + $0x18] sm:$0xff]   ;;  %v419_v11 = vld [vmem:[#allocation5 + $0x30] sm:$0xff]   ;;  %s539_s3 = scalar_lea.vmem %s317_s27, 128  ;;  %p544_p13 = scmp.lt.s32.totalorder %s317_s27, %s317_s27 }
  0x5f   :  { %365 = vmatprep.subr.bf16.mxu0 %v576_v0  ;;  %385 = vmatprep.subr.bf16.mxu1 %v576_v0  ;;  %v425_v12 = vld [vmem:[#allocation8 + $0x20] sm:$0xff]   ;;  %v420_v13 = vld [vmem:[#allocation5 + $0x38] sm:$0xff]   ;;  %v426_v14 = vld [vmem:[#allocation8 + $0x28] sm:$0xff]   ;;  %p540_p12 = scmp.ne.s32.totalorder %s317_s27, %s539_s3  ;;  %p545_p0 = scmp.lt.s32.totalorder %s539_s3, %s539_s3 }
  0x60   :  { %v84_v15 = vld [vmem:[#allocation2] sm:$0xf]  ;;  %v427_v16 = vld [vmem:[#allocation8 + $0x30] sm:$0xff]   ;;  %v327_v18 = vld [vmem:[#allocation7] ss:$0 sm:$0xff] }
  0x61   :  { %v428_v17 = vld [vmem:[#allocation8 + $0x38] sm:$0xff]   ;;  %v336_v26 = vld [vmem:[#allocation10] ss:$0 sm:$0xff]  ;;  %p546_p1 = por %p545_p0, %p544_p13 }
  0x62   :  { %366 = vmatpush3.bf16.msra.mxu0 %v414_v2  ;;  %386 = vmatpush3.bf16.msra.mxu1 %v422_v6 }
  0x63   :  { %367 = vmatprep.subr.bf16.mxu0 %v576_v0  ;;  %387 = vmatprep.subr.bf16.mxu1 %v576_v0  ;;  %p547_p2 = pnand %p546_p1, %p540_p12 }
  0x66   :  { %368 = vmatpush3.bf16.msra.mxu0 %v415_v3  ;;  %388 = vmatpush3.bf16.msra.mxu1 %v423_v8 }
  0x67   :  { %369 = vmatprep.subr.bf16.mxu0 %v576_v0  ;;  %389 = vmatprep.subr.bf16.mxu1 %v576_v0 }
  0x6a   :  { %370 = vmatpush3.bf16.msra.mxu0 %v416_v5  ;;  %390 = vmatpush3.bf16.msra.mxu1 %v424_v10 }
  0x6b   :  { %371 = vmatprep.subr.bf16.mxu0 %v576_v0  ;;  %391 = vmatprep.subr.bf16.mxu1 %v576_v0 }
  0x6e   :  { %372 = vmatpush3.bf16.msra.mxu0 %v417_v7  ;;  %392 = vmatpush3.bf16.msra.mxu1 %v425_v12 }
  0x6f   :  { %373 = vmatprep.subr.bf16.mxu0 %v576_v0  ;;  %393 = vmatprep.subr.bf16.mxu1 %v576_v0 }
  0x72   :  { %374 = vmatpush3.bf16.msra.mxu0 %v418_v9  ;;  %394 = vmatpush3.bf16.msra.mxu1 %v426_v14 }
  0x73   :  { %375 = vmatprep.subr.bf16.mxu0 %v576_v0  ;;  %395 = vmatprep.subr.bf16.mxu1 %v576_v0 }
  0x76   :  { %376 = vmatpush3.bf16.msra.mxu0 %v419_v11  ;;  %396 = vmatpush3.bf16.msra.mxu1 %v427_v16 }
  0x77   :  { %377 = vmatprep.subr.bf16.mxu0 %v576_v0  ;;  %397 = vmatprep.subr.bf16.mxu1 %v576_v0 }
  0x7a   :  { %378 = vmatpush3.bf16.msra.mxu0 %v420_v13  ;;  %398 = vmatpush3.bf16.msra.mxu1 %v428_v17 }
  0x7d   :  { %380 = vmatmul.mubr.bf16.vlgmr.msra.gmra.mrb[0].mxu0 %v84_v15 }
 0x150   :  { %v190_v19 = vpop.f32.mrb[0].mxu0 }
 0x151   :  { %v191_v20 = vadd.f32 %v327_v18, %v190_v19  ;;  %v381_v21 = vpop.f32.mrb[1].mxu0 }
 0x152   :  { %v193_v22 = vpop.f32.mrb[2].mxu0 }
 0x153   :  { %v196_v23 = vmax.f32 %v191_v20, 0.0  ;;  %v382_v24 = vpop.f32.mrb[3].mxu0 }
 0x155   :  { %v197_v25 = vpack.c.bf16 %v196_v23, %v196_v23 }
 0x157   :  { %400 = vmatmul.mubr.bf16.vlgmr.msra.gmra.mrb[0].mxu1 %v197_v25 }
 0x22a   :  { %v303_v27 = vpop.f32.mrb[0].mxu1 }
 0x22b   :  { %v304_v28 = vadd.f32 %v336_v26, %v303_v27  ;;  %v401_v29 = vpop.f32.mrb[1].mxu1 }
 0x22c   :  { %v306_v30 = vpop.f32.mrb[2].mxu1 }
 0x22d   :  { %309 = vst [vmem:[#allocation11] sm:$0xff] %v304_v28  ;;  %v402_v31 = vpop.f32.mrb[3].mxu1 }
 0x22e   :  { %550 = shalt.err (!%p547_p2)
}
 0x22f   :  { %s551_s30 = scalar_lea.hbm %s686_s5, 128 }
 0x230   :  { %p552_p3 = scmp.ne.s32.totalorder %s686_s5, %s551_s30  ;;  %p555_p4 = scmp.lt.u32.totalorder %s551_s30, %s686_s5 }
 0x232   :  { %p557_p5 = pnand %p555_p4, %p552_p3 }
 0x234   :  { %560 = shalt.err (!%p557_p5)
}
 0x235   :  { %319 = dma.vmem_to_hbm [thread:$0]  %s317_s27, 128, %s686_s5, [#allocation4]  }
 0x236   :  { %567 = dma.done.wait [#allocation4], 128  }
 0x237   :  { %568 = vsyncadd [#allocation4], 4294967168 }
 0x238   :  { %323 = vsyncpa [#allocation3], 1 }
 0x239   :  { %324 = vsyncpa [#allocation6], 1 }
 0x23a   :  { %325 = vsyncpa [#allocation9], 1 }
 0x23b   :  { %326 = vsyncpa [#allocation4], 1 }

</bundles_post_ra>
